<compile_context>
chip_gen: v7x
topology: tpu7x:2x2x1
jax: 0.10.0
libtpu: 0.0.40
codegen_flags: <defaults>
</compile_context>

<pallas_src>
import functools

import jax
import jax.numpy as jnp
from jax import lax
from jax.experimental import pallas as pl
from jax.experimental.pallas import tpu as pltpu


def _round_up(x, m):
    return ((x + m - 1) // m) * m


def _largest_div_tile(n_pad, cap):
    for t in (1024, 512, 256, 128):
        if t <= cap and n_pad % t == 0:
            return t
    return 128


def _choose_tiles(n_pad, d, operand_itemsize, kk):
    """D-aware, generation-aware tile selection (perf review items 7-9)."""
    try:
        vmem = pltpu.get_tpu_info().vmem_capacity_bytes
    except Exception:          # non-TPU tracing / old runtime: be conservative
        vmem = 64 << 20
    vmem_limit = (96 << 20) if vmem >= (96 << 20) else (48 << 20)
    budget = vmem_limit - (12 << 20)            # pipelining / compiler headroom

    tn = _largest_div_tile(n_pad, 256)          # asymmetric tiles: TM >= TN
    tm = 128
    for cand in (1024, 512, 256, 128):
        if n_pad % cand:
            continue
        need = (2 * cand * d * operand_itemsize      # X row block, dbl-buffered
                + 2 * tn * d * operand_itemsize      # X col block, dbl-buffered
                + 12 * cand * tn * 4                 # (TM, TN) f32 temporaries
                + 8 * (cand + tn + cand * kk))       # norms + winner blocks
        if need <= budget:
            tm = cand
            break
    # Keep >= 2 row tiles so the "parallel" row axis spans both v7x TensorCores.
    if n_pad // tm < 2:
        tm = _largest_div_tile(n_pad, max(128, n_pad // 2))
    return tm, tn, vmem_limit


# ---------------------------------------------------------------------------
# Fused kernel: one (TM, TN) tile of pairwise squared distances -> its kk
# smallest entries as packed f32 keys (quantised d^2, local column index in
# the low mantissa bits), written once per grid cell.
# ---------------------------------------------------------------------------
def _knn_block_kernel(xr_ref, xc_ref, sqr_ref, sqc_ref, out_ref, *, kk,
                      lane_mask):
    # Gram term on the MXU; contraction on the last dim of BOTH operands, so
    # no explicit transpose / XLU relayout is needed.
    gram = lax.dot_general(
        xr_ref[...], xc_ref[...],
        dimension_numbers=(((1,), (1,)), ((), ())),
        preferred_element_type=jnp.float32)                  # (TM, TN) f32

    # True squared distance (>= 0).  Poisoned (padded) columns carry a huge
    # finite sqc, so they lose every selection without any in-kernel masking.
    d2 = sqr_ref[...] + sqc_ref[...] - 2.0 * gram
    d2 = jnp.maximum(d2, 1e-30)   # clamp cancellation noise; avoid denormals

    # Pack the block-local column index into the low bits of the mantissa:
    # a single min-reduce then yields (quantised value, index) at once.
    col = lax.broadcasted_iota(jnp.int32, d2.shape, 1)
    bits = pltpu.bitcast(d2, jnp.int32)
    packed = pltpu.bitcast((bits & jnp.int32(~lane_mask)) | col, jnp.float32)

    tm = d2.shape[0]
    lane = lax.broadcasted_iota(jnp.int32, (tm, kk), 1)
    winners = jnp.full((tm, kk), jnp.inf, jnp.float32)
    for r in range(kk):                              # kk <= k = 5: unrolled
        m = jnp.min(packed, axis=1, keepdims=True)   # (TM, 1): single reduce
        winners = jnp.where(lane == r, m, winners)
        packed = jnp.where(packed == m, jnp.inf, packed)   # knock out winner
    out_ref[0, :, :] = winners


def pallas_knn_candidates(X, *, kk):
    """Per-row, per-column-tile kk nearest candidates of X.

    Returns (keys, idx), each (n, n_col_tiles * kk): packed f32 sort keys
    (ordering == quantised squared-distance ordering) and decoded global
    column indices.  The N x N matrix is never materialised.
    """
    n, d = X.shape
    n_pad = _round_up(n, 128)
    use_bf16 = d >= 256      # bf16 MXU feed only where the matmul matters
    in_dtype = jnp.bfloat16 if use_bf16 else jnp.float32
    tm, tn, vmem_limit = _choose_tiles(n_pad, d, 2 if use_bf16 else 4, kk)

    Xf = X.astype(jnp.float32)
    Xp = jnp.pad(Xf, ((0, n_pad - n), (0, 0)))
    sq = jnp.sum(Xp * Xp, axis=1)
    # Pre-poison padded columns with a huge FINITE value (not inf: the packed
    # key of an inf bucket would be a NaN bit pattern).
    sq_col = jnp.where(jnp.arange(n_pad) < n, sq, jnp.float32(3.0e38))
    sq_row = sq.reshape(n_pad, 1)
    sq_col = sq_col.reshape(1, n_pad)
    Xin = Xp.astype(in_dtype)

    nbi, nbj = n_pad // tm, n_pad // tn
    keys3 = pl.pallas_call(
        functools.partial(_knn_block_kernel, kk=kk, lane_mask=tn - 1),
        out_shape=jax.ShapeDtypeStruct((nbj, n_pad, kk), jnp.float32),
        grid=(nbi, nbj),
        in_specs=[
            pl.BlockSpec((tm, d), lambda i, j: (i, 0)),    # X row block
            pl.BlockSpec((tn, d), lambda i, j: (j, 0)),    # X column block
            pl.BlockSpec((tm, 1), lambda i, j: (i, 0)),    # row squared norms
            pl.BlockSpec((1, tn), lambda i, j: (0, j)),    # col squared norms
        ],
        out_specs=pl.BlockSpec((1, tm, kk), lambda i, j: (j, i, 0)),
        compiler_params=pltpu.CompilerParams(
            dimension_semantics=("parallel", "parallel"),
            vmem_limit_bytes=vmem_limit),
    )(Xin, Xin, sq_row, sq_col)

    # (nbj, n_pad, kk) -> (n, nbj * kk); decode global column indices.
    keys = jnp.moveaxis(keys3[:, :n, :], 0, 1).reshape(n, nbj * kk)
    bits = lax.bitcast_convert_type(keys, jnp.int32)
    blk = (jnp.arange(nbj * kk, dtype=jnp.int32) // kk)[None, :]
    idx = blk * tn + (bits & jnp.int32(tn - 1))
    return keys, idx


# ---------------------------------------------------------------------------
# Full forward (LNSA_loss.forward)
# ---------------------------------------------------------------------------
def lnsa_loss(X, Z, *, k=5, eps=1e-7, with_aux=False):
    X = X.astype(jnp.float32)
    Z = Z.astype(jnp.float32)
    n = X.shape[0]

    mean_x = jnp.mean(X, axis=0)
    mean_z = jnp.mean(Z, axis=0)
    normA1 = jnp.quantile(jnp.sqrt(jnp.sum((X - mean_x) ** 2, axis=1)), 0.98)
    normA2 = jnp.quantile(jnp.sqrt(jnp.sum((Z - mean_z) ** 2, axis=1)), 0.98)

    kk = min(k, n)
    keys, idx_all = pallas_knn_candidates(X, kk=kk)            # (n, C) each

    # Cross-tile merge: kk globally smallest candidates per row (tiny, JAX).
    order = jnp.argsort(keys, axis=1)[:, :kk]
    idx_top = jnp.take_along_axis(idx_all, order, axis=1)      # (n, kk)

    # Exclude self by index (falls back to dropping the nearest candidate,
    # mirroring the reference's `values[:, 1:]`).
    rows = jnp.arange(n, dtype=jnp.int32)[:, None]
    is_self = idx_top == rows
    has_self = jnp.any(is_self, axis=1, keepdims=True)
    drop = jnp.where(has_self, is_self, jnp.arange(kk)[None, :] == 0)
    keep = jnp.argsort(drop.astype(jnp.int32), axis=1)         # stable sort
    idx_nb = jnp.take_along_axis(idx_top, keep, axis=1)[:, :kk - 1]   # (n, kk-1)

    # Exact distances to the selected neighbours, recomputed directly and
    # re-sorted ascending so the k-th NN sits last, exactly as torch.topk.
    x_d2 = jnp.sum((X[:, None, :] - X[idx_nb]) ** 2, axis=-1)
    ordx = jnp.argsort(x_d2, axis=1)
    idx_nb = jnp.take_along_axis(idx_nb, ordx, axis=1)
    x_d = jnp.sqrt(jnp.take_along_axis(x_d2, ordx, axis=1))
    x_vals = (x_d + eps) / normA1

    # Z side: only the N x (kk-1) needed distances; the reference's full
    # z_dist matrix never exists.
    z_d = jnp.sqrt(jnp.sum((Z[:, None, :] - Z[idx_nb]) ** 2, axis=-1))
    z_vals = (z_d + eps) / normA2

    lid_x = (1.0 / k) * jnp.sum(jnp.log10(x_vals) - jnp.log10(x_vals[:, -1:]),
                                axis=1) + eps
    lid_z = (1.0 / k) * jnp.sum(jnp.log10(z_vals) - jnp.log10(z_vals[:, -1:]),
                                axis=1) + eps
    loss = jnp.sum((lid_x - lid_z) ** 2) / n
    if with_aux:
        return loss, x_d
    return loss


# ---------------------------------------------------------------------------
# Pure-JAX reference (mirrors the PyTorch module) for validation.
# ---------------------------------------------------------------------------
def lnsa_loss_ref(X, Z, *, k=5, eps=1e-7):
    X = X.astype(jnp.float32)
    Z = Z.astype(jnp.float32)
    n = X.shape[0]
    mean_x = jnp.mean(X, axis=0)
    mean_z = jnp.mean(Z, axis=0)
    normA1 = jnp.quantile(jnp.sqrt(jnp.sum((X - mean_x) ** 2, axis=1)), 0.98)
    normA2 = jnp.quantile(jnp.sqrt(jnp.sum((Z - mean_z) ** 2, axis=1)), 0.98)

    def cdist(A):
        return jnp.sqrt(jnp.sum((A[:, None, :] - A[None, :, :]) ** 2, axis=-1))

    x_dist = (cdist(X) + eps) / normA1
    z_dist = (cdist(Z) + eps) / normA2
    kk = min(k, n)
    neg_vals, idx = lax.top_k(-x_dist, kk)
    vals = (-neg_vals)[:, 1:]
    idx = idx[:, 1:]
    ext = jnp.take_along_axis(z_dist, idx, axis=1)
    lid_x = (1.0 / k) * jnp.sum(jnp.log10(vals) - jnp.log10(vals[:, -1:]),
                                axis=1) + eps
    lid_z = (1.0 / k) * jnp.sum(jnp.log10(ext) - jnp.log10(ext[:, -1:]),
                                axis=1) + eps
    return jnp.sum((lid_x - lid_z) ** 2) / n


if __name__ == "__main__":
    # The module has no learnable parameters (only k / eps hyper-parameters).
    key = jax.random.PRNGKey(0)

    def check(n, dx, dz, k):
        kx, kz = jax.random.split(jax.random.fold_in(key, n))
        X = jax.random.normal(kx, (n, dx), dtype=jnp.float32)
        Z = jax.random.normal(kz, (n, dz), dtype=jnp.float32)
        out, x_d = lnsa_loss(X, Z, k=k, eps=1e-7, with_aux=True)
        out = jax.block_until_ready(out)
        ref = jax.block_until_ready(lnsa_loss_ref(X, Z, k=k, eps=1e-7))
        assert jnp.isfinite(out), "non-finite loss"
        # Tie-robust structural check: the selected k-NN distances must match
        # brute force (near-tie index swaps barely move these values).
        kk = min(k, n)
        d2_full = jnp.sum((X[:, None, :] - X[None, :, :]) ** 2, axis=-1)
        ref_d = jnp.sqrt(jnp.sort(d2_full, axis=1)[:, 1:kk])
        assert float(jnp.max(jnp.abs(x_d - ref_d))) < 1e-2, "knn distance mismatch"
        # Loss check: tolerant of legitimate near-tie neighbour swaps caused by
        # the mantissa-packed keys / MXU rounding, but tight enough to catch
        # structural bugs (those shift the loss by orders of magnitude more).
        assert abs(float(out) - float(ref)) < 1e-3 + 0.05 * abs(float(ref)), \
            (float(out), float(ref))

    check(32, 16, 8, 5)     # single-tile path
    check(300, 24, 12, 5)   # multi-tile path with row/column padding
    print("KERNEL_OK")
</pallas_src>

<mosaic_0001>
module attributes {stable_mosaic.version = 11 : i64} {
  func.func @_knn_block_kernel(%arg0: i32, %arg1: i32, %arg2: memref<128x16xf32, #tpu.memory_space<vmem>>, %arg3: memref<128x16xf32, #tpu.memory_space<vmem>>, %arg4: memref<128x1xf32, #tpu.memory_space<vmem>>, %arg5: memref<1x128xf32, #tpu.memory_space<vmem>>, %arg6: memref<1x128x5xf32, #tpu.memory_space<vmem>>) attributes {dimension_semantics = [#tpu.dimension_semantics<parallel>, #tpu.dimension_semantics<parallel>], iteration_bounds = array<i64: 1, 1>, scalar_prefetch = 0 : i64, scratch_operands = 0 : i64, tpu.core_type = #tpu.core_type<tc>, window_params = [{transform_indices = @transform_0, window_bounds = array<i64: 128, 16>}, {transform_indices = @transform_1, window_bounds = array<i64: 128, 16>}, {transform_indices = @transform_2, window_bounds = array<i64: 128, 1>}, {transform_indices = @transform_3, window_bounds = array<i64: 1, 128>}, {transform_indices = @transform_4, window_bounds = array<i64: 1, 128, 5>}]} {
    %c0 = arith.constant 0 : index
    %c0_0 = arith.constant 0 : index
    %0 = vector.load %arg2[%c0, %c0_0] : memref<128x16xf32, #tpu.memory_space<vmem>>, vector<128x16xf32>
    %c0_1 = arith.constant 0 : index
    %c0_2 = arith.constant 0 : index
    %1 = vector.load %arg3[%c0_1, %c0_2] : memref<128x16xf32, #tpu.memory_space<vmem>>, vector<128x16xf32>
    %cst = arith.constant dense<0.000000e+00> : vector<128x128xf32>
    %2 = tpu.matmul %0, %1, %cst {dimension_numbers = #tpu.dot_dimension_numbers<[1], [1], [0], [0], [0, 0, 1, 0], [], []>} : vector<128x16xf32>, vector<128x16xf32>, vector<128x128xf32> -> vector<128x128xf32>
    %c0_3 = arith.constant 0 : index
    %c0_4 = arith.constant 0 : index
    %3 = vector.load %arg4[%c0_3, %c0_4] : memref<128x1xf32, #tpu.memory_space<vmem>>, vector<128x1xf32>
    %c0_5 = arith.constant 0 : index
    %c0_6 = arith.constant 0 : index
    %4 = vector.load %arg5[%c0_5, %c0_6] : memref<1x128xf32, #tpu.memory_space<vmem>>, vector<1x128xf32>
    %5 = vector.broadcast %3 : vector<128x1xf32> to vector<128x128xf32>
    %6 = vector.broadcast %4 : vector<1x128xf32> to vector<128x128xf32>
    %7 = arith.addf %5, %6 : vector<128x128xf32>
    %cst_7 = arith.constant 2.000000e+00 : f32
    %8 = vector.broadcast %cst_7 : f32 to vector<128x128xf32>
    %9 = arith.mulf %8, %2 : vector<128x128xf32>
    %10 = arith.subf %7, %9 : vector<128x128xf32>
    %cst_8 = arith.constant 1.000000e-30 : f32
    %11 = vector.broadcast %cst_8 : f32 to vector<128x128xf32>
    %12 = arith.maximumf %10, %11 : vector<128x128xf32>
    %13 = tpu.iota {dimensions = array<i32: 1>} : vector<128x128xi32>
    %14 = tpu.bitcast %12 : vector<128x128xf32> -> vector<128x128xi32>
    %c-128_i32 = arith.constant -128 : i32
    %15 = vector.broadcast %c-128_i32 : i32 to vector<128x128xi32>
    %16 = arith.andi %14, %15 : vector<128x128xi32>
    %17 = arith.ori %16, %13 : vector<128x128xi32>
    %18 = tpu.bitcast %17 : vector<128x128xi32> -> vector<128x128xf32>
    %19 = tpu.iota {dimensions = array<i32: 1>} : vector<128x5xi32>
    %cst_9 = arith.constant 0x7F800000 : f32
    %20 = vector.broadcast %cst_9 : f32 to vector<128x5xf32>
    %cst_10 = arith.constant dense<0x7F800000> : vector<128xf32>
    %21 = vector.multi_reduction <minimumf>, %18, %cst_10 [1] : vector<128x128xf32> to vector<128xf32>
    %22 = vector.shape_cast %21 : vector<128xf32> to vector<128x1xf32>
    %c0_i32 = arith.constant 0 : i32
    %23 = vector.broadcast %c0_i32 : i32 to vector<128x5xi32>
    %24 = arith.cmpi eq, %19, %23 : vector<128x5xi32>
    %25 = vector.shape_cast %22 : vector<128x1xf32> to vector<128x1xf32>
    %26 = vector.broadcast %25 : vector<128x1xf32> to vector<128x5xf32>
    %27 = arith.select %24, %26, %20 : vector<128x5xi1>, vector<128x5xf32>
    %28 = vector.broadcast %22 : vector<128x1xf32> to vector<128x128xf32>
    %29 = arith.cmpf oeq, %18, %28 : vector<128x128xf32>
    %cst_11 = arith.constant 0x7F800000 : f32
    %30 = vector.broadcast %cst_11 : f32 to vector<128x128xf32>
    %31 = arith.select %29, %30, %18 : vector<128x128xi1>, vector<128x128xf32>
    %cst_12 = arith.constant dense<0x7F800000> : vector<128xf32>
    %32 = vector.multi_reduction <minimumf>, %31, %cst_12 [1] : vector<128x128xf32> to vector<128xf32>
    %33 = vector.shape_cast %32 : vector<128xf32> to vector<128x1xf32>
    %c1_i32 = arith.constant 1 : i32
    %34 = vector.broadcast %c1_i32 : i32 to vector<128x5xi32>
    %35 = arith.cmpi eq, %19, %34 : vector<128x5xi32>
    %36 = vector.shape_cast %33 : vector<128x1xf32> to vector<128x1xf32>
    %37 = vector.broadcast %36 : vector<128x1xf32> to vector<128x5xf32>
    %38 = arith.select %35, %37, %27 : vector<128x5xi1>, vector<128x5xf32>
    %39 = vector.broadcast %33 : vector<128x1xf32> to vector<128x128xf32>
    %40 = arith.cmpf oeq, %31, %39 : vector<128x128xf32>
    %cst_13 = arith.constant 0x7F800000 : f32
    %41 = vector.broadcast %cst_13 : f32 to vector<128x128xf32>
    %42 = arith.select %40, %41, %31 : vector<128x128xi1>, vector<128x128xf32>
    %cst_14 = arith.constant dense<0x7F800000> : vector<128xf32>
    %43 = vector.multi_reduction <minimumf>, %42, %cst_14 [1] : vector<128x128xf32> to vector<128xf32>
    %44 = vector.shape_cast %43 : vector<128xf32> to vector<128x1xf32>
    %c2_i32 = arith.constant 2 : i32
    %45 = vector.broadcast %c2_i32 : i32 to vector<128x5xi32>
    %46 = arith.cmpi eq, %19, %45 : vector<128x5xi32>
    %47 = vector.shape_cast %44 : vector<128x1xf32> to vector<128x1xf32>
    %48 = vector.broadcast %47 : vector<128x1xf32> to vector<128x5xf32>
    %49 = arith.select %46, %48, %38 : vector<128x5xi1>, vector<128x5xf32>
    %50 = vector.broadcast %44 : vector<128x1xf32> to vector<128x128xf32>
    %51 = arith.cmpf oeq, %42, %50 : vector<128x128xf32>
    %cst_15 = arith.constant 0x7F800000 : f32
    %52 = vector.broadcast %cst_15 : f32 to vector<128x128xf32>
    %53 = arith.select %51, %52, %42 : vector<128x128xi1>, vector<128x128xf32>
    %cst_16 = arith.constant dense<0x7F800000> : vector<128xf32>
    %54 = vector.multi_reduction <minimumf>, %53, %cst_16 [1] : vector<128x128xf32> to vector<128xf32>
    %55 = vector.shape_cast %54 : vector<128xf32> to vector<128x1xf32>
    %c3_i32 = arith.constant 3 : i32
    %56 = vector.broadcast %c3_i32 : i32 to vector<128x5xi32>
    %57 = arith.cmpi eq, %19, %56 : vector<128x5xi32>
    %58 = vector.shape_cast %55 : vector<128x1xf32> to vector<128x1xf32>
    %59 = vector.broadcast %58 : vector<128x1xf32> to vector<128x5xf32>
    %60 = arith.select %57, %59, %49 : vector<128x5xi1>, vector<128x5xf32>
    %61 = vector.broadcast %55 : vector<128x1xf32> to vector<128x128xf32>
    %62 = arith.cmpf oeq, %53, %61 : vector<128x128xf32>
    %cst_17 = arith.constant 0x7F800000 : f32
    %63 = vector.broadcast %cst_17 : f32 to vector<128x128xf32>
    %64 = arith.select %62, %63, %53 : vector<128x128xi1>, vector<128x128xf32>
    %cst_18 = arith.constant dense<0x7F800000> : vector<128xf32>
    %65 = vector.multi_reduction <minimumf>, %64, %cst_18 [1] : vector<128x128xf32> to vector<128xf32>
    %66 = vector.shape_cast %65 : vector<128xf32> to vector<128x1xf32>
    %c4_i32 = arith.constant 4 : i32
    %67 = vector.broadcast %c4_i32 : i32 to vector<128x5xi32>
    %68 = arith.cmpi eq, %19, %67 : vector<128x5xi32>
    %69 = vector.shape_cast %66 : vector<128x1xf32> to vector<128x1xf32>
    %70 = vector.broadcast %69 : vector<128x1xf32> to vector<128x5xf32>
    %71 = arith.select %68, %70, %60 : vector<128x5xi1>, vector<128x5xf32>
    %c0_19 = arith.constant 0 : index
    %c0_20 = arith.constant 0 : index
    %c0_21 = arith.constant 0 : index
    %72 = vector.load %arg6[%c0_19, %c0_20, %c0_21] : memref<1x128x5xf32, #tpu.memory_space<vmem>>, vector<1x128x5xf32>
    %73 = vector.shape_cast %72 : vector<1x128x5xf32> to vector<128x5xf32>
    %74 = vector.shape_cast %71 : vector<128x5xf32> to vector<1x128x5xf32>
    tpu.vector_store %arg6[%c0_19, %c0_20, %c0_21], %74 {strides = array<i32>} : memref<1x128x5xf32, #tpu.memory_space<vmem>>, vector<1x128x5xf32>,
    return
  }
  func.func @transform_0(%arg0: i32, %arg1: i32) -> (i32, i32) {
    %c0_i32 = arith.constant 0 : i32
    %c0_i32_0 = arith.constant 0 : i32
    return %arg0, %c0_i32 : i32, i32
  }
  func.func @transform_1(%arg0: i32, %arg1: i32) -> (i32, i32) {
    %c0_i32 = arith.constant 0 : i32
    %c0_i32_0 = arith.constant 0 : i32
    return %arg1, %c0_i32 : i32, i32
  }
  func.func @transform_2(%arg0: i32, %arg1: i32) -> (i32, i32) {
    %c0_i32 = arith.constant 0 : i32
    %c0_i32_0 = arith.constant 0 : i32
    return %arg0, %c0_i32 : i32, i32
  }
  func.func @transform_3(%arg0: i32, %arg1: i32) -> (i32, i32) {
    %c0_i32 = arith.constant 0 : i32
    %c0_i32_0 = arith.constant 0 : i32
    return %c0_i32, %arg1 : i32, i32
  }
  func.func @transform_4(%arg0: i32, %arg1: i32) -> (i32, i32, i32) {
    %c0_i32 = arith.constant 0 : i32
    %c0_i32_0 = arith.constant 0 : i32
    return %arg1, %arg0, %c0_i32 : i32, i32, i32
  }
}

</mosaic_0001>

<bundles_post_ra>
// kernel: tpu_custom_call.1
= control target key start
LH: loop header
LB: loop body
LE: loop exit
PB: predicated region body
PF: predicated region fallthrough
CT: control target
= control target key end

     0   :  { %vm49_vm0 = vcmask 130048   ;;  %v1106_v3 = vmov 0   ;;  %s2126_s1 = inlined_call_operand.vmem [shape: f32[128,16], index: 1, kind: input, shape index: {}]   ;;  %s2127_s0 = inlined_call_operand.vmem [shape: f32[128,16], index: 0, kind: input, shape index: {}]   ;;  %s2128_s2 = inlined_call_operand.vmem [shape: f32[128,1], index: 2, kind: input, shape index: {}]   ;;  %s2129_s3 = inlined_call_operand.vmem [shape: f32[1,128], index: 3, kind: input, shape index: {}]   ;;  %s2130_s4 = inlined_call_operand.vmem [shape: f32[1,128,5], index: 4, kind: output, shape index: {}]  }
   0x1   :  { %v33_v0 = vld [vmem:[%s2126_s1] sm:$0xff]  ;;  %v34_v1 = vld [vmem:[%s2126_s1 + $0x8] sm:$0xff]  ;;  %vm1140_vm1 = vmpackc.low %vm49_vm0, %vm49_vm0  ;;  %1105 = vset.pattern.permute.xlu1 %v1106_v3  ;;  %1104 = vset.pattern.permute.xlu0 %v1106_v3 }
   0x2   :  { %v1039_v4 = vpack.c.bf16 %v34_v1, %v33_v0  ;;  %v35_v5 = vld [vmem:[%s2126_s1 + $0x10] sm:$0xff]  ;;  %v36_v6 = vld [vmem:[%s2126_s1 + $0x18] sm:$0xff]  ;;  %v17_v8 = vld [vmem:[%s2127_s0] sm:$0xff] }
   0x3   :  { %v1045_v7 = vpack.c.bf16 %v36_v6, %v35_v5  ;;  %v37_v9 = vld [vmem:[%s2126_s1 + $0x20] sm:$0xff]  ;;  %v38_v10 = vld [vmem:[%s2126_s1 + $0x28] sm:$0xff]  ;;  %1015 = vmatprep.mubr.msk.f32.mxu0 %vm49_vm0, %v17_v8  ;;  %v293_v13 = vld [vmem:[%s2128_s2 + $0x10] sm:$0xff] }
   0x4   :  { %1041 = vmatprep.subr.msk.bf16.mxu0 %vm1140_vm1, %v1039_v4  ;;  %1087 = vmatprep.subr.msk.bf16.mxu1 %vm1140_vm1, %v1039_v4  ;;  %v25_v11 = vld [vmem:[%s2127_s0 + $0x40] sm:$0xff]  ;;  %v1051_v12 = vpack.c.bf16 %v38_v10, %v37_v9  ;;  %v39_v15 = vld [vmem:[%s2126_s1 + $0x30] sm:$0xff]  ;;  %v40_v16 = vld [vmem:[%s2126_s1 + $0x38] sm:$0xff] }
   0x5   :  { %1044 = vmatpush3.bf16.xpose.msk.msra.mxu0 %vm1140_vm1, %v1039_v4  ;;  %1095 = vmatpush3.bf16.xpose.msk.msra.mxu1 %vm1140_vm1, %v1039_v4  ;;  %v291_v14 = vld [vmem:[%s2128_s2] sm:$0xff]  ;;  %v294_v17 = vld [vmem:[%s2128_s2 + $0x18] sm:$0xff]  ;;  %v292_v18 = vld [vmem:[%s2128_s2 + $0x8] sm:$0xff]  ;;  %v1057_v19 = vpack.c.bf16 %v40_v16, %v39_v15 }
   0x6   :  { %1047 = vmatprep.subr.msk.bf16.mxu0 %vm1140_vm1, %v1045_v7  ;;  %1088 = vmatprep.subr.msk.bf16.mxu1 %vm1140_vm1, %v1045_v7  ;;  %v296_v20 = vld [vmem:[%s2128_s2 + $0x28] sm:$0xff]  ;;  %v295_v21 = vld [vmem:[%s2128_s2 + $0x20] sm:$0xff]  ;;  %v298_v24 = vld [vmem:[%s2128_s2 + $0x38] sm:$0xff] }
   0x7   :  { %1027 = vmatprep.mubr.msk.f32.mxu1 %vm49_vm0, %v25_v11  ;;  %320 = vperm.xlu1 %1105, %v293_v13   ;;  %v41_v22 = vld [vmem:[%s2126_s1 + $0x40] sm:$0xff]  ;;  %v42_v23 = vld [vmem:[%s2126_s1 + $0x48] sm:$0xff]  ;;  %v297_v25 = vld [vmem:[%s2128_s2 + $0x30] sm:$0xff] }
   0x8   :  { %310 = vperm.xlu0 %1104, %v291_v14   ;;  %v1063_v26 = vpack.c.bf16 %v42_v23, %v41_v22  ;;  %v300_v27 = vld [vmem:[%s2128_s2 + $0x48] sm:$0xff]  ;;  %v299_v28 = vld [vmem:[%s2128_s2 + $0x40] sm:$0xff]  ;;  %v43_v29 = vld [vmem:[%s2126_s1 + $0x50] sm:$0xff] }
   0x9   :  { %v44_v30 = vld [vmem:[%s2126_s1 + $0x58] sm:$0xff]  ;;  %v301_v32 = vld [vmem:[%s2128_s2 + $0x50] sm:$0xff]  ;;  %v304_v34 = vld [vmem:[%s2128_s2 + $0x68] sm:$0xff] }
   0xa   :  { %v302_v31 = vld [vmem:[%s2128_s2 + $0x58] sm:$0xff]  ;;  %v1069_v33 = vpack.c.bf16 %v44_v30, %v43_v29  ;;  %v303_v35 = vld [vmem:[%s2128_s2 + $0x60] sm:$0xff]  ;;  %v46_v37 = vld [vmem:[%s2126_s1 + $0x68] sm:$0xff] }
   0xb   :  { %325 = vperm.xlu1 %1105, %v294_v17   ;;  %v45_v36 = vld [vmem:[%s2126_s1 + $0x60] sm:$0xff]  ;;  %v306_v38 = vld [vmem:[%s2128_s2 + $0x78] sm:$0xff]  ;;  %v305_v39 = vld [vmem:[%s2128_s2 + $0x70] sm:$0xff] }
   0xc   :  { %315 = vperm.xlu0 %1104, %v292_v18   ;;  %v1075_v40 = vpack.c.bf16 %v46_v37, %v45_v36  ;;  %v47_v41 = vld [vmem:[%s2126_s1 + $0x70] sm:$0xff]  ;;  %v48_v42 = vld [vmem:[%s2126_s1 + $0x78] sm:$0xff]  ;;  %v18_v44 = vld [vmem:[%s2127_s0 + $0x8] sm:$0xff] }
   0xd   :  { %1050 = vmatpush3.bf16.xpose.msk.msra.mxu0 %vm1140_vm1, %v1045_v7  ;;  %1096 = vmatpush3.bf16.xpose.msk.msra.mxu1 %vm1140_vm1, %v1045_v7  ;;  %v1081_v43 = vpack.c.bf16 %v48_v42, %v47_v41  ;;  %v26_v45 = vld [vmem:[%s2127_s0 + $0x48] sm:$0xff]  ;;  %v19_v46 = vld [vmem:[%s2127_s0 + $0x10] sm:$0xff]  ;;  %v20_v48 = vld [vmem:[%s2127_s0 + $0x18] sm:$0xff]  ;;  %v458_v7 = vlaneseq }
   0xe   :  { %1053 = vmatprep.subr.msk.bf16.mxu0 %vm1140_vm1, %v1051_v12  ;;  %1089 = vmatprep.subr.msk.bf16.mxu1 %vm1140_vm1, %v1051_v12  ;;  %v27_v47 = vld [vmem:[%s2127_s0 + $0x50] sm:$0xff]  ;;  %v28_v49 = vld [vmem:[%s2127_s0 + $0x58] sm:$0xff]  ;;  %v21_v50 = vld [vmem:[%s2127_s0 + $0x20] sm:$0xff] }
   0xf   :  { %335 = vperm.xlu1 %1105, %v296_v20   ;;  %v29_v51 = vld [vmem:[%s2127_s0 + $0x60] sm:$0xff]  ;;  %v22_v52 = vld [vmem:[%s2127_s0 + $0x28] sm:$0xff]  ;;  %v23_v54 = vld [vmem:[%s2127_s0 + $0x30] sm:$0xff] }
  0x10   :  { %330 = vperm.xlu0 %1104, %v295_v21   ;;  %v30_v53 = vld [vmem:[%s2127_s0 + $0x68] sm:$0xff]  ;;  %v31_v55 = vld [vmem:[%s2127_s0 + $0x70] sm:$0xff]  ;;  %v24_v56 = vld [vmem:[%s2127_s0 + $0x38] sm:$0xff] }
  0x11   :  { %v32_v57 = vld [vmem:[%s2127_s0 + $0x78] sm:$0xff]  ;;  %v1371_v3 = vld [vmem:[%s2129_s3] ss:$0 sm:$0xff] }
  0x13   :  { %345 = vperm.xlu1 %1105, %v298_v24  }
  0x14   :  { %340 = vperm.xlu0 %1104, %v297_v25  }
  0x15   :  { %1056 = vmatpush3.bf16.xpose.msk.msra.mxu0 %vm1140_vm1, %v1051_v12  ;;  %1097 = vmatpush3.bf16.xpose.msk.msra.mxu1 %vm1140_vm1, %v1051_v12 }
  0x16   :  { %1059 = vmatprep.subr.msk.bf16.mxu0 %vm1140_vm1, %v1057_v19  ;;  %1090 = vmatprep.subr.msk.bf16.mxu1 %vm1140_vm1, %v1057_v19 }
  0x17   :  { %355 = vperm.xlu1 %1105, %v300_v27  }
  0x18   :  { %350 = vperm.xlu0 %1104, %v299_v28  }
  0x1b   :  { %365 = vperm.xlu1 %1105, %v302_v31  }
  0x1c   :  { %360 = vperm.xlu0 %1104, %v301_v32  }
  0x1d   :  { %1062 = vmatpush3.bf16.xpose.msk.msra.mxu0 %vm1140_vm1, %v1057_v19  ;;  %1098 = vmatpush3.bf16.xpose.msk.msra.mxu1 %vm1140_vm1, %v1057_v19 }
  0x1e   :  { %1065 = vmatprep.subr.msk.bf16.mxu0 %vm1140_vm1, %v1063_v26  ;;  %1091 = vmatprep.subr.msk.bf16.mxu1 %vm1140_vm1, %v1063_v26 }
  0x1f   :  { %375 = vperm.xlu1 %1105, %v304_v34  }
  0x20   :  { %370 = vperm.xlu0 %1104, %v303_v35  }
  0x23   :  { %385 = vperm.xlu1 %1105, %v306_v38  }
  0x24   :  { %380 = vperm.xlu0 %1104, %v305_v39  }
  0x25   :  { %1068 = vmatpush3.bf16.xpose.msk.msra.mxu0 %vm1140_vm1, %v1063_v26  ;;  %1099 = vmatpush3.bf16.xpose.msk.msra.mxu1 %vm1140_vm1, %v1063_v26  ;;  %v1378_v26 = vand.u32 127, %v458_v7 }
  0x26   :  { %1071 = vmatprep.subr.msk.bf16.mxu0 %vm1140_vm1, %v1069_v33  ;;  %1092 = vmatprep.subr.msk.bf16.mxu1 %vm1140_vm1, %v1069_v33 }
  0x2d   :  { %1074 = vmatpush3.bf16.xpose.msk.msra.mxu0 %vm1140_vm1, %v1069_v33  ;;  %1100 = vmatpush3.bf16.xpose.msk.msra.mxu1 %vm1140_vm1, %v1069_v33 }
  0x2e   :  { %1077 = vmatprep.subr.msk.bf16.mxu0 %vm1140_vm1, %v1075_v40  ;;  %1093 = vmatprep.subr.msk.bf16.mxu1 %vm1140_vm1, %v1075_v40 }
  0x35   :  { %1080 = vmatpush3.bf16.xpose.msk.msra.mxu0 %vm1140_vm1, %v1075_v40  ;;  %1101 = vmatpush3.bf16.xpose.msk.msra.mxu1 %vm1140_vm1, %v1075_v40 }
  0x36   :  { %1083 = vmatprep.subr.msk.bf16.mxu0 %vm1140_vm1, %v1081_v43  ;;  %1094 = vmatprep.subr.msk.bf16.mxu1 %vm1140_vm1, %v1081_v43 }
  0x3d   :  { %1086 = vmatpush3.bf16.xpose.msk.msra.mxu0 %vm1140_vm1, %v1081_v43  ;;  %1102 = vmatpush3.bf16.xpose.msk.msra.mxu1 %vm1140_vm1, %v1081_v43 }
  0x44   :  { %1016 = vmatmul.mubr.msk.f32.vlgmr.msra.gmra.mrb[0].mxu0 %vm49_vm0, %v18_v44  ;;  %1028 = vmatmul.mubr.msk.f32.vlgmr.msra.gmra.mrb[0].mxu1 %vm49_vm0, %v26_v45 }
  0x45   :  { %1018 = vmatprep.mubr.msk.f32.mxu0 %vm49_vm0, %v19_v46  ;;  %1030 = vmatprep.mubr.msk.f32.mxu1 %vm49_vm0, %v27_v47 }
  0x48   :  { %1019 = vmatmul.mubr.msk.f32.gmra.mrb[2].mxu0 %vm49_vm0, %v20_v48  ;;  %1031 = vmatmul.mubr.msk.f32.gmra.mrb[2].mxu1 %vm49_vm0, %v28_v49 }
  0x49   :  { %1021 = vmatprep.mubr.msk.f32.mxu0 %vm49_vm0, %v21_v50  ;;  %1033 = vmatprep.mubr.msk.f32.mxu1 %vm49_vm0, %v29_v51 }
  0x4c   :  { %1022 = vmatmul.mubr.msk.f32.gmra.mrb[4].mxu0 %vm49_vm0, %v22_v52  ;;  %1034 = vmatmul.mubr.msk.f32.gmra.mrb[4].mxu1 %vm49_vm0, %v30_v53 }
  0x4d   :  { %1024 = vmatprep.mubr.msk.f32.mxu0 %vm49_vm0, %v23_v54  ;;  %1036 = vmatprep.mubr.msk.f32.mxu1 %vm49_vm0, %v31_v55 }
  0x50   :  { %1025 = vmatmul.mubr.msk.f32.gmra.mrb[6].mxu0 %vm49_vm0, %v24_v56  ;;  %1037 = vmatmul.mubr.msk.f32.gmra.mrb[6].mxu1 %vm49_vm0, %v32_v57 }
  0x86   :  { %v321_v59 = vpop.permute.xlu1 %320 }
  0x87   :  { %v311_v58 = vpop.permute.xlu0 %310  ;;  %v396_v55 = vadd.f32 %v1371_v3, %v321_v59 }
  0x88   :  { %v394_v14 = vadd.f32 %v1371_v3, %v311_v58 }
  0x8a   :  { %v326_v61 = vpop.permute.xlu1 %325 }
  0x8b   :  { %v316_v60 = vpop.permute.xlu0 %315  ;;  %v397_v21 = vadd.f32 %v1371_v3, %v326_v61 }
  0x8c   :  { %v395_v9 = vadd.f32 %v1371_v3, %v316_v60 }
  0x8e   :  { %v1362_v63 = vpop.permute.xlu1 %335 }
  0x8f   :  { %v331_v62 = vpop.permute.xlu0 %330 }
  0x90   :  { %v398_v56 = vadd.f32 %v1371_v3, %v331_v62 }
  0x92   :  { %v1366_v1 = vpop.permute.xlu1 %345 }
  0x93   :  { %v1364_v0 = vpop.permute.xlu0 %340 }
  0x96   :  { %v356_v4 = vpop.permute.xlu1 %355 }
  0x97   :  { %v351_v2 = vpop.permute.xlu0 %350  ;;  %v403_v8 = vadd.f32 %v1371_v3, %v356_v4 }
  0x98   :  { %v402_v15 = vadd.f32 %v1371_v3, %v351_v2 }
  0x9a   :  { %v366_v27 = vpop.permute.xlu1 %365 }
  0x9b   :  { %v361_v18 = vpop.permute.xlu0 %360  ;;  %v405_v32 = vadd.f32 %v1371_v3, %v366_v27 }
  0x9c   :  { %v404_v40 = vadd.f32 %v1371_v3, %v361_v18 }
  0x9e   :  { %v376_v58 = vpop.permute.xlu1 %375 }
  0x9f   :  { %v371_v45 = vpop.permute.xlu0 %370 }
  0xa0   :  { %v406_v57 = vadd.f32 %v1371_v3, %v371_v45 }
 0x117   :  { %v1017_v5 = vpop.f32.mrb[0].mxu0  ;;  %v1029_v6 = vpop.f32.mrb[0].mxu1 }
 0x118   :  { %v411_v10 = vmul.f32 2.0, %v1017_v5  ;;  %v419_v11 = vmul.f32 2.0, %v1029_v6  ;;  %v212_v12 = vpop.f32.mrb[1].mxu0  ;;  %v252_v13 = vpop.f32.mrb[1].mxu1 }
 0x119   :  { %v410_v16 = vmul.f32 2.0, %v212_v12  ;;  %v418_v17 = vmul.f32 2.0, %v252_v13 }
 0x11a   :  { %v427_v19 = vsub.f32 %v395_v9, %v411_v10  ;;  %v435_v20 = vsub.f32 %v403_v8, %v419_v11 }
 0x11b   :  { %v426_v22 = vsub.f32 %v394_v14, %v410_v16  ;;  %v434_v23 = vsub.f32 %v402_v15, %v418_v17  ;;  %v1020_v24 = vpop.f32.mrb[2].mxu0  ;;  %v1032_v25 = vpop.f32.mrb[2].mxu1  ;;  %v399_v15 = vadd.f32 %v1371_v3, %v1362_v63  ;;  %v407_v16 = vadd.f32 %v1371_v3, %v376_v58 }
 0x11c   :  { %v443_v28 = vmax.f32 %v427_v19, 1e-30  ;;  %v451_v29 = vmax.f32 %v435_v20, 1e-30  ;;  %v413_v30 = vmul.f32 2.0, %v1020_v24  ;;  %v421_v31 = vmul.f32 2.0, %v1032_v25 }
 0x11d   :  { %v442_v33 = vmax.f32 %v426_v22, 1e-30  ;;  %v450_v34 = vmax.f32 %v434_v23, 1e-30  ;;  %v222_v35 = vpop.f32.mrb[3].mxu0  ;;  %v262_v36 = vpop.f32.mrb[3].mxu1  ;;  %v400_v17 = vadd.f32 %v1371_v3, %v1364_v0 }
 0x11e   :  { %v477_v37 = vand.u32 4294967168, %v443_v28  ;;  %v485_v38 = vand.u32 4294967168, %v451_v29  ;;  %v429_v39 = vsub.f32 %v397_v21, %v413_v30  ;;  %v437_v41 = vsub.f32 %v405_v32, %v421_v31  ;;  %v381_v22 = vpop.permute.xlu0 %380 }
 0x11f   :  { %v420_v42 = vmul.f32 2.0, %v262_v36  ;;  %v1023_v43 = vpop.f32.mrb[4].mxu0  ;;  %v1035_v44 = vpop.f32.mrb[4].mxu1  ;;  %v484_v46 = vand.u32 4294967168, %v450_v34  ;;  %v412_v48 = vmul.f32 2.0, %v222_v35  ;;  %v476_v49 = vand.u32 4294967168, %v442_v33 }
 0x120   :  { %v445_v47 = vmax.f32 %v429_v39, 1e-30  ;;  %v232_v51 = vpop.f32.mrb[5].mxu0  ;;  %v272_v52 = vpop.f32.mrb[5].mxu1  ;;  %v1383_v53 = vor.u32 %v485_v38, %v1378_v26  ;;  %v1386_v54 = vor.u32 %v477_v37, %v1378_v26  ;;  %v453_v60 = vmax.f32 %v437_v41, 1e-30 }
 0x121   :  { %v436_v50 = vsub.f32 %v404_v40, %v420_v42  ;;  %v414_v2 = vmul.f32 2.0, %v232_v51  ;;  %v422_v4 = vmul.f32 2.0, %v272_v52  ;;  %v428_v6 = vsub.f32 %v396_v55, %v412_v48  ;;  %v386_v41 = vpop.permute.xlu1 %385 }
 0x122   :  { %542 = vmin.xlane.f32.xlu0 %v1383_v53  ;;  %526 = vmin.xlane.f32.xlu1 %v1386_v54  ;;  %v479_v5 = vand.u32 4294967168, %v445_v47  ;;  %v415_v7 = vmul.f32 2.0, %v1023_v43  ;;  %v1394_v59 = vor.u32 %v484_v46, %v1378_v26  ;;  %v1397_v14 = vor.u32 %v476_v49, %v1378_v26 }
 0x123   :  { %v452_v61 = vmax.f32 %v436_v50, 1e-30  ;;  %v1026_v8 = vpop.f32.mrb[6].mxu0  ;;  %v1038_v9 = vpop.f32.mrb[6].mxu1  ;;  %v430_v10 = vsub.f32 %v398_v56, %v414_v2  ;;  %v438_v11 = vsub.f32 %v406_v57, %v422_v4  ;;  %v487_v18 = vand.u32 4294967168, %v453_v60 }
 0x124   :  { %v242_v12 = vpop.f32.mrb[7].mxu0  ;;  %v282_v13 = vpop.f32.mrb[7].mxu1  ;;  %v423_v19 = vmul.f32 2.0, %v1035_v44  ;;  %v444_v23 = vmax.f32 %v428_v6, 1e-30  ;;  %v431_v24 = vsub.f32 %v399_v15, %v415_v7  ;;  %v1410_v0 = vor.u32 %v479_v5, %v1378_v26 }
 0x125   :  { %v486_v62 = vand.u32 4294967168, %v452_v61  ;;  %v446_v20 = vmax.f32 %v430_v10, 1e-30  ;;  %v416_v21 = vmul.f32 2.0, %v242_v12  ;;  %v454_v25 = vmax.f32 %v438_v11, 1e-30 }
 0x126   :  { %540 = vmin.xlane.f32.xlu1 %v1394_v59  ;;  %524 = vmin.xlane.f32.xlu0 %v1397_v14  ;;  %v424_v27 = vmul.f32 2.0, %v282_v13  ;;  %v408_v30 = vadd.f32 %v1371_v3, %v381_v22  ;;  %v439_v31 = vsub.f32 %v407_v16, %v423_v19  ;;  %v478_v32 = vand.u32 4294967168, %v444_v23 }
 0x127   :  { %v480_v28 = vand.u32 4294967168, %v446_v20  ;;  %v432_v63 = vsub.f32 %v400_v17, %v416_v21  ;;  %v1407_v29 = vor.u32 %v486_v62, %v1378_v26  ;;  %v447_v33 = vmax.f32 %v431_v24, 1e-30 }
 0x128   :  { %v488_v34 = vand.u32 4294967168, %v454_v25  ;;  %v417_v35 = vmul.f32 2.0, %v1026_v8  ;;  %v440_v37 = vsub.f32 %v408_v30, %v424_v27  ;;  %v503_v38 = vor.u32 %v487_v18, %v1378_v26 }
 0x129   :  { %v448_v36 = vmax.f32 %v432_v63, 1e-30  ;;  %v1417_v39 = vor.u32 %v480_v28, %v1378_v26  ;;  %v401_v40 = vadd.f32 %v1371_v3, %v1366_v1  ;;  %v481_v42 = vand.u32 4294967168, %v447_v33 }
 0x12a   :  { %544 = vmin.xlane.f32.xlu1 %v1407_v29  ;;  %530 = vmin.xlane.f32.xlu0 %v1410_v0  ;;  %v455_v43 = vmax.f32 %v439_v31, 1e-30  ;;  %v425_v45 = vmul.f32 2.0, %v1038_v9  ;;  %v456_v47 = vmax.f32 %v440_v37, 1e-30  ;;  %v494_v48 = vor.u32 %v478_v32, %v1378_v26 }
 0x12b   :  { %v433_v44 = vsub.f32 %v401_v40, %v417_v35  ;;  %v482_v46 = vand.u32 4294967168, %v448_v36  ;;  %v1424_v49 = vor.u32 %v488_v34, %v1378_v26  ;;  %v409_v50 = vadd.f32 %v1371_v3, %v386_v41 }
 0x12c   :  { %v489_v1 = vand.u32 4294967168, %v455_v43  ;;  %v490_v55 = vand.u32 4294967168, %v456_v47  ;;  %v497_v56 = vor.u32 %v481_v42, %v1378_v26 }
 0x12d   :  { %v441_v51 = vsub.f32 %v409_v50, %v425_v45  ;;  %v449_v52 = vmax.f32 %v433_v44, 1e-30  ;;  %v1430_v57 = vor.u32 %v482_v46, %v1378_v26 }
 0x12e   :  { %546 = vmin.xlane.f32.xlu0 %v503_v38  ;;  %532 = vmin.xlane.f32.xlu1 %v1417_v39  ;;  %v505_v61 = vor.u32 %v489_v1, %v1378_v26  ;;  %v1435_v3 = vor.u32 %v490_v55, %v1378_v26 }
 0x12f   :  { %v483_v58 = vand.u32 4294967168, %v449_v52  ;;  %v457_v60 = vmax.f32 %v441_v51, 1e-30 }
 0x131   :  { %v491_v2 = vand.u32 4294967168, %v457_v60  ;;  %v499_v4 = vor.u32 %v483_v58, %v1378_v26 }
 0x132   :  { %528 = vmin.xlane.f32.xlu0 %v494_v48  ;;  %548 = vmin.xlane.f32.xlu1 %v1424_v49 }
 0x133   :  { %v507_v5 = vor.u32 %v491_v2, %v1378_v26 }
 0x136   :  { %534 = vmin.xlane.f32.xlu0 %v497_v56  ;;  %536 = vmin.xlane.f32.xlu1 %v1430_v57 }
 0x13a   :  { %550 = vmin.xlane.f32.xlu0 %v505_v61  ;;  %552 = vmin.xlane.f32.xlu1 %v1435_v3 }
 0x13e   :  { %538 = vmin.xlane.f32.xlu0 %v499_v4 }
 0x142   :  { %554 = vmin.xlane.f32.xlu0 %v507_v5 }
 0x1af   :  { %v1440_v6 = vpop.xlane.xlu0 %542  ;;  %v1442_v7 = vpop.xlane.xlu1 %526 }
 0x1b0   :  { %vm574_vm2 = vcmp.eq.f32.partialorder %v1386_v54, %v1442_v7  ;;  %vm582_vm3 = vcmp.eq.f32.partialorder %v1383_v53, %v1440_v6 }
 0x1b1   :  { %v1447_v8 = vsel %vm574_vm2, inf, %v1386_v54  ;;  %v1459_v10 = vsel %vm582_vm3, inf, %v1383_v53  ;;  %vm556_vm2 = vcmp.eq.s32.totalorder %v1378_v26, 0  ;;  %vm637_vm3 = vcmp.eq.s32.totalorder %v1378_v26, 1 }
 0x1b2   :  { %607 = vmin.xlane.f32.xlu0 %v1447_v8  ;;  %v558_v33 = vsel %vm556_vm2, %v1442_v7, inf  ;;  %v566_v37 = vsel %vm556_vm2, %v1440_v6, inf }
 0x1b3   :  { %v1452_v9 = vpop.xlane.xlu1 %540  ;;  %v1454_v62 = vpop.xlane.xlu0 %524 }
 0x1b4   :  { %vm573_vm4 = vcmp.eq.f32.partialorder %v1397_v14, %v1454_v62  ;;  %vm581_vm5 = vcmp.eq.f32.partialorder %v1394_v59, %v1452_v9  ;;  %v565_v45 = vsel %vm556_vm2, %v1452_v9, inf }
 0x1b5   :  { %v1462_v11 = vsel %vm573_vm4, inf, %v1397_v14  ;;  %v1478_v13 = vsel %vm581_vm5, inf, %v1394_v59 }
 0x1b6   :  { %623 = vmin.xlane.f32.xlu0 %v1459_v10  ;;  %605 = vmin.xlane.f32.xlu1 %v1462_v11 }
 0x1b7   :  { %v1468_v54 = vpop.xlane.xlu1 %544  ;;  %v1470_v12 = vpop.xlane.xlu0 %530 }
 0x1b8   :  { %vm576_vm6 = vcmp.eq.f32.partialorder %v1410_v0, %v1470_v12  ;;  %vm583_vm9 = vcmp.eq.f32.partialorder %v1407_v29, %v1468_v54  ;;  %v560_v46 = vsel %vm556_vm2, %v1470_v12, inf  ;;  %v567_v2 = vsel %vm556_vm2, %v1468_v54, inf }
 0x1b9   :  { %v1475_v53 = vsel %vm576_vm6, inf, %v1410_v0  ;;  %v1506_v21 = vsel %vm583_vm9, inf, %v1407_v29 }
 0x1ba   :  { %611 = vmin.xlane.f32.xlu0 %v1475_v53  ;;  %621 = vmin.xlane.f32.xlu1 %v1478_v13 }
 0x1bb   :  { %v1482_v14 = vpop.xlane.xlu0 %546  ;;  %v1485_v15 = vpop.xlane.xlu1 %532 }
 0x1bc   :  { %vm584_vm7 = vcmp.eq.f32.partialorder %v503_v38, %v1482_v14  ;;  %vm577_vm11 = vcmp.eq.f32.partialorder %v1417_v39, %v1485_v15  ;;  %v568_v52 = vsel %vm556_vm2, %v1482_v14, inf }
 0x1bd   :  { %v1487_v16 = vsel %vm584_vm7, inf, %v503_v38  ;;  %v1520_v25 = vsel %vm577_vm11, inf, %v1417_v39  ;;  %v557_v38 = vsel %vm556_vm2, %v1454_v62, inf }
 0x1be   :  { %627 = vmin.xlane.f32.xlu0 %v1487_v16 }
 0x1bf   :  { %v1490_v17 = vpop.xlane.xlu0 %528  ;;  %v1498_v18 = vpop.xlane.xlu1 %548 }
 0x1c0   :  { %vm575_vm8 = vcmp.eq.f32.partialorder %v494_v48, %v1490_v17  ;;  %vm585_vm13 = vcmp.eq.f32.partialorder %v1424_v49, %v1498_v18  ;;  %v559_v58 = vsel %vm556_vm2, %v1490_v17, inf }
 0x1c1   :  { %v1493_v59 = vsel %vm575_vm8, inf, %v494_v48  ;;  %v1532_v63 = vsel %vm585_vm13, inf, %v1424_v49 }
 0x1c2   :  { %609 = vmin.xlane.f32.xlu1 %v1493_v59 }
 0x1c3   :  { %v1500_v19 = vpop.xlane.xlu0 %534  ;;  %v1515_v23 = vpop.xlane.xlu1 %536 }
 0x1c4   :  { %vm578_vm10 = vcmp.eq.f32.partialorder %v497_v56, %v1500_v19  ;;  %vm579_vm15 = vcmp.eq.f32.partialorder %v1430_v57, %v1515_v23 }
 0x1c5   :  { %v1503_v20 = vsel %vm578_vm10, inf, %v497_v56  ;;  %v1546_v31 = vsel %vm579_vm15, inf, %v1430_v57 }
 0x1c6   :  { %615 = vmin.xlane.f32.xlu0 %v1503_v20  ;;  %625 = vmin.xlane.f32.xlu1 %v1506_v21 }
 0x1c7   :  { %v1512_v22 = vpop.xlane.xlu0 %550  ;;  %v1538_v29 = vpop.xlane.xlu1 %552 }
 0x1c8   :  { %vm586_vm12 = vcmp.eq.f32.partialorder %v505_v61, %v1512_v22  ;;  %vm587_vm1 = vcmp.eq.f32.partialorder %v1435_v3, %v1538_v29 }
 0x1c9   :  { %v1517_v24 = vsel %vm586_vm12, inf, %v505_v61  ;;  %v1553_v32 = vsel %vm587_vm1, inf, %v1435_v3 }
 0x1ca   :  { %631 = vmin.xlane.f32.xlu0 %v1517_v24  ;;  %613 = vmin.xlane.f32.xlu1 %v1520_v25 }
 0x1cb   :  { %v1526_v27 = vpop.xlane.xlu0 %538 }
 0x1cc   :  { %vm580_vm14 = vcmp.eq.f32.partialorder %v499_v4, %v1526_v27  ;;  %v564_v17 = vsel %vm556_vm2, %v1526_v27, inf }
 0x1cd   :  { %v1529_v28 = vsel %vm580_vm14, inf, %v499_v4  ;;  %v562_v4 = vsel %vm556_vm2, %v1500_v19, inf }
 0x1ce   :  { %619 = vmin.xlane.f32.xlu0 %v1529_v28  ;;  %629 = vmin.xlane.f32.xlu1 %v1532_v63 }
 0x1cf   :  { %v1540_v0 = vpop.xlane.xlu0 %554 }
 0x1d0   :  { %vm588_vm0 = vcmp.eq.f32.partialorder %v507_v5, %v1540_v0 }
 0x1d1   :  { %v1543_v30 = vsel %vm588_vm0, inf, %v507_v5 }
 0x1d2   :  { %635 = vmin.xlane.f32.xlu0 %v1543_v30  ;;  %617 = vmin.xlane.f32.xlu1 %v1546_v31 }
 0x1d6   :  { %633 = vmin.xlane.f32.xlu1 %v1553_v32 }
 0x23f   :  { %v608_v34 = vpop.xlane.xlu0 %607 }
 0x240   :  { %v1563_v35 = vsel %vm637_vm3, %v608_v34, %v558_v33  ;;  %vm655_vm4 = vcmp.eq.f32.partialorder %v1447_v8, %v608_v34 }
 0x241   :  { %v1567_v36 = vsel %vm655_vm4, inf, %v1447_v8 }
 0x242   :  { %688 = vmin.xlane.f32.xlu0 %v1567_v36 }
 0x243   :  { %v624_v39 = vpop.xlane.xlu0 %623  ;;  %v606_v40 = vpop.xlane.xlu1 %605 }
 0x244   :  { %v1578_v41 = vsel %vm637_vm3, %v624_v39, %v566_v37  ;;  %vm663_vm5 = vcmp.eq.f32.partialorder %v1459_v10, %v624_v39  ;;  %v1583_v42 = vsel %vm637_vm3, %v606_v40, %v557_v38  ;;  %vm654_vm6 = vcmp.eq.f32.partialorder %v1462_v11, %v606_v40 }
 0x245   :  { %v1587_v43 = vsel %vm663_vm5, inf, %v1459_v10  ;;  %v1590_v44 = vsel %vm654_vm6, inf, %v1462_v11  ;;  %v561_v10 = vsel %vm556_vm2, %v1485_v15, inf  ;;  %v570_v11 = vsel %vm556_vm2, %v1512_v22, inf }
 0x246   :  { %704 = vmin.xlane.f32.xlu0 %v1587_v43  ;;  %686 = vmin.xlane.f32.xlu1 %v1590_v44  ;;  %vm718_vm6 = vcmp.eq.s32.totalorder %v1378_v26, 2 }
 0x247   :  { %v612_v47 = vpop.xlane.xlu0 %611  ;;  %v622_v48 = vpop.xlane.xlu1 %621 }
 0x248   :  { %v1602_v49 = vsel %vm637_vm3, %v612_v47, %v560_v46  ;;  %vm657_vm7 = vcmp.eq.f32.partialorder %v1475_v53, %v612_v47  ;;  %v1607_v50 = vsel %vm637_vm3, %v622_v48, %v565_v45  ;;  %vm662_vm8 = vcmp.eq.f32.partialorder %v1478_v13, %v622_v48 }
 0x249   :  { %v1611_v1 = vsel %vm657_vm7, inf, %v1475_v53  ;;  %v1614_v51 = vsel %vm662_vm8, inf, %v1478_v13 }
 0x24a   :  { %692 = vmin.xlane.f32.xlu0 %v1611_v1  ;;  %702 = vmin.xlane.f32.xlu1 %v1614_v51 }
 0x24b   :  { %v628_v55 = vpop.xlane.xlu0 %627 }
 0x24c   :  { %v1623_v56 = vsel %vm637_vm3, %v628_v55, %v568_v52  ;;  %vm665_vm9 = vcmp.eq.f32.partialorder %v1487_v16, %v628_v55 }
 0x24d   :  { %v1627_v57 = vsel %vm665_vm9, inf, %v1487_v16  ;;  %v569_v16 = vsel %vm556_vm2, %v1498_v18, inf }
 0x24e   :  { %708 = vmin.xlane.f32.xlu0 %v1627_v57 }
 0x24f   :  { %v610_v60 = vpop.xlane.xlu1 %609 }
 0x250   :  { %v1635_v61 = vsel %vm637_vm3, %v610_v60, %v559_v58  ;;  %vm656_vm10 = vcmp.eq.f32.partialorder %v1493_v59, %v610_v60 }
 0x251   :  { %v1639_v3 = vsel %vm656_vm10, inf, %v1493_v59 }
 0x252   :  { %690 = vmin.xlane.f32.xlu1 %v1639_v3 }
 0x253   :  { %v616_v5 = vpop.xlane.xlu0 %615  ;;  %v626_v6 = vpop.xlane.xlu1 %625 }
 0x254   :  { %v1650_v7 = vsel %vm637_vm3, %v616_v5, %v562_v4  ;;  %vm659_vm11 = vcmp.eq.f32.partialorder %v1503_v20, %v616_v5  ;;  %v1655_v8 = vsel %vm637_vm3, %v626_v6, %v567_v2  ;;  %vm664_vm12 = vcmp.eq.f32.partialorder %v1506_v21, %v626_v6 }
 0x255   :  { %v1659_v9 = vsel %vm659_vm11, inf, %v1503_v20  ;;  %v1662_v62 = vsel %vm664_vm12, inf, %v1506_v21 }
 0x256   :  { %696 = vmin.xlane.f32.xlu0 %v1659_v9  ;;  %706 = vmin.xlane.f32.xlu1 %v1662_v62 }
 0x257   :  { %v632_v54 = vpop.xlane.xlu0 %631  ;;  %v614_v12 = vpop.xlane.xlu1 %613 }
 0x258   :  { %v1674_v53 = vsel %vm637_vm3, %v632_v54, %v570_v11  ;;  %vm667_vm13 = vcmp.eq.f32.partialorder %v1517_v24, %v632_v54  ;;  %v1679_v13 = vsel %vm637_vm3, %v614_v12, %v561_v10  ;;  %vm658_vm14 = vcmp.eq.f32.partialorder %v1520_v25, %v614_v12 }
 0x259   :  { %v1683_v14 = vsel %vm667_vm13, inf, %v1517_v24  ;;  %v1686_v15 = vsel %vm658_vm14, inf, %v1520_v25  ;;  %v563_v24 = vsel %vm556_vm2, %v1515_v23, inf }
 0x25a   :  { %712 = vmin.xlane.f32.xlu0 %v1683_v14  ;;  %694 = vmin.xlane.f32.xlu1 %v1686_v15 }
 0x25b   :  { %v620_v59 = vpop.xlane.xlu0 %619  ;;  %v630_v19 = vpop.xlane.xlu1 %629 }
 0x25c   :  { %v1698_v20 = vsel %vm637_vm3, %v620_v59, %v564_v17  ;;  %vm661_vm15 = vcmp.eq.f32.partialorder %v1529_v28, %v620_v59  ;;  %v1703_v21 = vsel %vm637_vm3, %v630_v19, %v569_v16  ;;  %vm666_vm0 = vcmp.eq.f32.partialorder %v1532_v63, %v630_v19 }
 0x25d   :  { %v1707_v18 = vsel %vm661_vm15, inf, %v1529_v28  ;;  %v1710_v22 = vsel %vm666_vm0, inf, %v1532_v63 }
 0x25e   :  { %700 = vmin.xlane.f32.xlu0 %v1707_v18  ;;  %710 = vmin.xlane.f32.xlu1 %v1710_v22 }
 0x25f   :  { %v1717_v25 = vpop.xlane.xlu0 %635  ;;  %v618_v27 = vpop.xlane.xlu1 %617 }
 0x260   :  { %vm669_vm1 = vcmp.eq.f32.partialorder %v1543_v30, %v1717_v25  ;;  %v1723_v28 = vsel %vm637_vm3, %v618_v27, %v563_v24  ;;  %vm660_vm4 = vcmp.eq.f32.partialorder %v1546_v31, %v618_v27 }
 0x261   :  { %v1727_v63 = vsel %vm669_vm1, inf, %v1543_v30  ;;  %v1730_v33 = vsel %vm660_vm4, inf, %v1546_v31 }
 0x262   :  { %716 = vmin.xlane.f32.xlu0 %v1727_v63  ;;  %698 = vmin.xlane.f32.xlu1 %v1730_v33 }
 0x263   :  { %v1734_v23 = vpop.xlane.xlu1 %633 }
 0x264   :  { %vm668_vm5 = vcmp.eq.f32.partialorder %v1553_v32, %v1734_v23 }
 0x265   :  { %v1739_v34 = vsel %vm668_vm5, inf, %v1553_v32 }
 0x266   :  { %714 = vmin.xlane.f32.xlu1 %v1739_v34 }
 0x2cf   :  { %v689_v30 = vpop.xlane.xlu0 %688 }
 0x2d0   :  { %v1746_v31 = vsel %vm718_vm6, %v689_v30, %v1563_v35  ;;  %vm736_vm7 = vcmp.eq.f32.partialorder %v1567_v36, %v689_v30 }
 0x2d1   :  { %v1750_v37 = vsel %vm736_vm7, inf, %v1567_v36 }
 0x2d2   :  { %769 = vmin.xlane.f32.xlu0 %v1750_v37 }
 0x2d3   :  { %v705_v38 = vpop.xlane.xlu0 %704  ;;  %v687_v32 = vpop.xlane.xlu1 %686 }
 0x2d4   :  { %v1756_v39 = vsel %vm718_vm6, %v705_v38, %v1578_v41  ;;  %vm744_vm8 = vcmp.eq.f32.partialorder %v1587_v43, %v705_v38  ;;  %v1762_v35 = vsel %vm718_vm6, %v687_v32, %v1583_v42  ;;  %vm735_vm9 = vcmp.eq.f32.partialorder %v1590_v44, %v687_v32 }
 0x2d5   :  { %v1766_v36 = vsel %vm744_vm8, inf, %v1587_v43  ;;  %v1769_v40 = vsel %vm735_vm9, inf, %v1590_v44 }
 0x2d6   :  { %785 = vmin.xlane.f32.xlu0 %v1766_v36  ;;  %767 = vmin.xlane.f32.xlu1 %v1769_v40 }
 0x2d7   :  { %v693_v41 = vpop.xlane.xlu0 %692  ;;  %v703_v45 = vpop.xlane.xlu1 %702 }
 0x2d8   :  { %v1776_v46 = vsel %vm718_vm6, %v693_v41, %v1602_v49  ;;  %vm738_vm10 = vcmp.eq.f32.partialorder %v1611_v1, %v693_v41  ;;  %v1782_v42 = vsel %vm718_vm6, %v703_v45, %v1607_v50  ;;  %vm743_vm11 = vcmp.eq.f32.partialorder %v1614_v51, %v703_v45 }
 0x2d9   :  { %v1786_v43 = vsel %vm738_vm10, inf, %v1611_v1  ;;  %v1789_v44 = vsel %vm743_vm11, inf, %v1614_v51  ;;  %vm799_vm10 = vcmp.eq.s32.totalorder %v1378_v26, 3 }
 0x2da   :  { %773 = vmin.xlane.f32.xlu0 %v1786_v43  ;;  %783 = vmin.xlane.f32.xlu1 %v1789_v44 }
 0x2db   :  { %v709_v47 = vpop.xlane.xlu0 %708 }
 0x2dc   :  { %v1796_v48 = vsel %vm718_vm6, %v709_v47, %v1623_v56  ;;  %vm746_vm12 = vcmp.eq.f32.partialorder %v1627_v57, %v709_v47 }
 0x2dd   :  { %v1800_v49 = vsel %vm746_vm12, inf, %v1627_v57 }
 0x2de   :  { %789 = vmin.xlane.f32.xlu0 %v1800_v49 }
 0x2df   :  { %v691_v50 = vpop.xlane.xlu1 %690 }
 0x2e0   :  { %v1806_v1 = vsel %vm718_vm6, %v691_v50, %v1635_v61  ;;  %vm737_vm13 = vcmp.eq.f32.partialorder %v1639_v3, %v691_v50 }
 0x2e1   :  { %v1810_v51 = vsel %vm737_vm13, inf, %v1639_v3 }
 0x2e2   :  { %771 = vmin.xlane.f32.xlu1 %v1810_v51 }
 0x2e3   :  { %v697_v52 = vpop.xlane.xlu0 %696  ;;  %v707_v55 = vpop.xlane.xlu1 %706 }
 0x2e4   :  { %v1816_v56 = vsel %vm718_vm6, %v697_v52, %v1650_v7  ;;  %vm740_vm14 = vcmp.eq.f32.partialorder %v1659_v9, %v697_v52  ;;  %v1822_v57 = vsel %vm718_vm6, %v707_v55, %v1655_v8  ;;  %vm745_vm15 = vcmp.eq.f32.partialorder %v1662_v62, %v707_v55 }
 0x2e5   :  { %v1826_v58 = vsel %vm740_vm14, inf, %v1659_v9  ;;  %v1829_v60 = vsel %vm745_vm15, inf, %v1662_v62 }
 0x2e6   :  { %777 = vmin.xlane.f32.xlu0 %v1826_v58  ;;  %787 = vmin.xlane.f32.xlu1 %v1829_v60 }
 0x2e7   :  { %v713_v61 = vpop.xlane.xlu0 %712  ;;  %v695_v3 = vpop.xlane.xlu1 %694 }
 0x2e8   :  { %v1836_v2 = vsel %vm718_vm6, %v713_v61, %v1674_v53  ;;  %vm748_vm0 = vcmp.eq.f32.partialorder %v1683_v14, %v713_v61  ;;  %v1842_v4 = vsel %vm718_vm6, %v695_v3, %v1679_v13  ;;  %vm739_vm1 = vcmp.eq.f32.partialorder %v1686_v15, %v695_v3 }
 0x2e9   :  { %v1846_v5 = vsel %vm748_vm0, inf, %v1683_v14  ;;  %v1849_v6 = vsel %vm739_vm1, inf, %v1686_v15 }
 0x2ea   :  { %793 = vmin.xlane.f32.xlu0 %v1846_v5  ;;  %775 = vmin.xlane.f32.xlu1 %v1849_v6 }
 0x2eb   :  { %v701_v7 = vpop.xlane.xlu0 %700  ;;  %v711_v8 = vpop.xlane.xlu1 %710 }
 0x2ec   :  { %v1856_v9 = vsel %vm718_vm6, %v701_v7, %v1698_v20  ;;  %vm742_vm4 = vcmp.eq.f32.partialorder %v1707_v18, %v701_v7  ;;  %v1862_v62 = vsel %vm718_vm6, %v711_v8, %v1703_v21  ;;  %vm747_vm5 = vcmp.eq.f32.partialorder %v1710_v22, %v711_v8 }
 0x2ed   :  { %v1866_v10 = vsel %vm742_vm4, inf, %v1707_v18  ;;  %v1869_v11 = vsel %vm747_vm5, inf, %v1710_v22 }
 0x2ee   :  { %781 = vmin.xlane.f32.xlu0 %v1866_v10  ;;  %791 = vmin.xlane.f32.xlu1 %v1869_v11 }
 0x2ef   :  { %v1873_v54 = vpop.xlane.xlu0 %716  ;;  %v699_v12 = vpop.xlane.xlu1 %698 }
 0x2f0   :  { %vm750_vm7 = vcmp.eq.f32.partialorder %v1727_v63, %v1873_v54  ;;  %v1880_v53 = vsel %vm718_vm6, %v699_v12, %v1723_v28  ;;  %vm741_vm8 = vcmp.eq.f32.partialorder %v1730_v33, %v699_v12 }
 0x2f1   :  { %v1884_v13 = vsel %vm750_vm7, inf, %v1727_v63  ;;  %v1887_v14 = vsel %vm741_vm8, inf, %v1730_v33 }
 0x2f2   :  { %797 = vmin.xlane.f32.xlu0 %v1884_v13  ;;  %779 = vmin.xlane.f32.xlu1 %v1887_v14 }
 0x2f3   :  { %v1891_v15 = vpop.xlane.xlu1 %714 }
 0x2f4   :  { %vm749_vm9 = vcmp.eq.f32.partialorder %v1739_v34, %v1891_v15 }
 0x2f5   :  { %v1896_v16 = vsel %vm749_vm9, inf, %v1739_v34 }
 0x2f6   :  { %795 = vmin.xlane.f32.xlu1 %v1896_v16 }
 0x35f   :  { %v770_v17 = vpop.xlane.xlu0 %769 }
 0x360   :  { %v1903_v59 = vsel %vm799_vm10, %v770_v17, %v1746_v31  ;;  %vm817_vm11 = vcmp.eq.f32.partialorder %v1750_v37, %v770_v17 }
 0x361   :  { %v833_v19 = vsel %vm817_vm11, inf, %v1750_v37 }
 0x362   :  { %850 = vmin.xlane.f32.xlu0 %v833_v19 }
 0x363   :  { %v786_v20 = vpop.xlane.xlu0 %785  ;;  %v768_v21 = vpop.xlane.xlu1 %767 }
 0x364   :  { %v1910_v18 = vsel %vm799_vm10, %v786_v20, %v1756_v39  ;;  %v1915_v22 = vsel %vm799_vm10, %v768_v21, %v1762_v35  ;;  %vm825_vm12 = vcmp.eq.f32.partialorder %v1766_v36, %v786_v20  ;;  %vm816_vm13 = vcmp.eq.f32.partialorder %v1769_v40, %v768_v21 }
 0x365   :  { %v841_v24 = vsel %vm825_vm12, inf, %v1766_v36  ;;  %v832_v27 = vsel %vm816_vm13, inf, %v1769_v40 }
 0x366   :  { %866 = vmin.xlane.f32.xlu0 %v841_v24  ;;  %848 = vmin.xlane.f32.xlu1 %v832_v27 }
 0x367   :  { %v774_v28 = vpop.xlane.xlu0 %773  ;;  %v784_v63 = vpop.xlane.xlu1 %783 }
 0x368   :  { %v1924_v33 = vsel %vm799_vm10, %v774_v28, %v1776_v46  ;;  %v1929_v34 = vsel %vm799_vm10, %v784_v63, %v1782_v42  ;;  %vm819_vm14 = vcmp.eq.f32.partialorder %v1786_v43, %v774_v28  ;;  %vm824_vm15 = vcmp.eq.f32.partialorder %v1789_v44, %v784_v63 }
 0x369   :  { %v835_v30 = vsel %vm819_vm14, inf, %v1786_v43  ;;  %v840_v31 = vsel %vm824_vm15, inf, %v1789_v44  ;;  %vm880_vm15 = vcmp.eq.s32.totalorder %v1378_v26, 4 }
 0x36a   :  { %854 = vmin.xlane.f32.xlu0 %v835_v30  ;;  %864 = vmin.xlane.f32.xlu1 %v840_v31  ;;  %v572_v30 = vsel %vm556_vm2, %v1540_v0, inf }
 0x36b   :  { %v790_v37 = vpop.xlane.xlu0 %789 }
 0x36c   :  { %v1938_v38 = vsel %vm799_vm10, %v790_v37, %v1796_v48  ;;  %vm827_vm0 = vcmp.eq.f32.partialorder %v1800_v49, %v790_v37 }
 0x36d   :  { %v843_v32 = vsel %vm827_vm0, inf, %v1800_v49  ;;  %vm897_vm0 = vcmask 39936  }
 0x36e   :  { %870 = vmin.xlane.f32.xlu0 %v843_v32 }
 0x36f   :  { %v772_v39 = vpop.xlane.xlu1 %771 }
 0x370   :  { %v1945_v35 = vsel %vm799_vm10, %v772_v39, %v1806_v1  ;;  %vm818_vm1 = vcmp.eq.f32.partialorder %v1810_v51, %v772_v39 }
 0x371   :  { %v834_v36 = vsel %vm818_vm1, inf, %v1810_v51 }
 0x372   :  { %852 = vmin.xlane.f32.xlu1 %v834_v36 }
 0x373   :  { %v778_v40 = vpop.xlane.xlu0 %777  ;;  %v788_v41 = vpop.xlane.xlu1 %787 }
 0x374   :  { %v1952_v45 = vsel %vm799_vm10, %v778_v40, %v1816_v56  ;;  %v1957_v46 = vsel %vm799_vm10, %v788_v41, %v1822_v57  ;;  %vm821_vm4 = vcmp.eq.f32.partialorder %v1826_v58, %v778_v40  ;;  %vm826_vm5 = vcmp.eq.f32.partialorder %v1829_v60, %v788_v41 }
 0x375   :  { %v837_v42 = vsel %vm821_vm4, inf, %v1826_v58  ;;  %v842_v43 = vsel %vm826_vm5, inf, %v1829_v60 }
 0x376   :  { %858 = vmin.xlane.f32.xlu0 %v837_v42  ;;  %868 = vmin.xlane.f32.xlu1 %v842_v43 }
 0x377   :  { %v794_v44 = vpop.xlane.xlu0 %793  ;;  %v776_v47 = vpop.xlane.xlu1 %775 }
 0x378   :  { %v1966_v48 = vsel %vm799_vm10, %v794_v44, %v1836_v2  ;;  %v1971_v49 = vsel %vm799_vm10, %v776_v47, %v1842_v4  ;;  %vm829_vm7 = vcmp.eq.f32.partialorder %v1846_v5, %v794_v44  ;;  %vm820_vm8 = vcmp.eq.f32.partialorder %v1849_v6, %v776_v47 }
 0x379   :  { %v845_v50 = vsel %vm829_vm7, inf, %v1846_v5  ;;  %v836_v1 = vsel %vm820_vm8, inf, %v1849_v6 }
 0x37a   :  { %874 = vmin.xlane.f32.xlu0 %v845_v50  ;;  %856 = vmin.xlane.f32.xlu1 %v836_v1 }
 0x37b   :  { %v782_v51 = vpop.xlane.xlu0 %781  ;;  %v792_v52 = vpop.xlane.xlu1 %791 }
 0x37c   :  { %v807_v55 = vsel %vm799_vm10, %v782_v51, %v1856_v9  ;;  %v812_v56 = vsel %vm799_vm10, %v792_v52, %v1862_v62  ;;  %vm823_vm9 = vcmp.eq.f32.partialorder %v1866_v10, %v782_v51  ;;  %vm828_vm11 = vcmp.eq.f32.partialorder %v1869_v11, %v792_v52 }
 0x37d   :  { %v839_v57 = vsel %vm823_vm9, inf, %v1866_v10  ;;  %v844_v58 = vsel %vm828_vm11, inf, %v1869_v11 }
 0x37e   :  { %862 = vmin.xlane.f32.xlu0 %v839_v57  ;;  %872 = vmin.xlane.f32.xlu1 %v844_v58 }
 0x37f   :  { %v798_v60 = vpop.xlane.xlu0 %797  ;;  %v780_v61 = vpop.xlane.xlu1 %779 }
 0x380   :  { %v806_v3 = vsel %vm799_vm10, %v780_v61, %v1880_v53  ;;  %vm831_vm12 = vcmp.eq.f32.partialorder %v1884_v13, %v798_v60  ;;  %vm822_vm13 = vcmp.eq.f32.partialorder %v1887_v14, %v780_v61 }
 0x381   :  { %v847_v2 = vsel %vm831_vm12, inf, %v1884_v13  ;;  %v838_v4 = vsel %vm822_vm13, inf, %v1887_v14 }
 0x382   :  { %878 = vmin.xlane.f32.xlu0 %v847_v2  ;;  %860 = vmin.xlane.f32.xlu1 %v838_v4 }
 0x383   :  { %v796_v5 = vpop.xlane.xlu1 %795 }
 0x384   :  { %vm830_vm14 = vcmp.eq.f32.partialorder %v1896_v16, %v796_v5 }
 0x385   :  { %v846_v6 = vsel %vm830_vm14, inf, %v1896_v16 }
 0x386   :  { %876 = vmin.xlane.f32.xlu1 %v846_v6 }
 0x3ef   :  { %v851_v7 = vpop.xlane.xlu0 %850 }
 0x3f0   :  { %v882_v8 = vsel %vm880_vm15, %v851_v7, %v1903_v59 }
 0x3f1   :  { %899 = vst.msk [vmem:[%s2130_s4 + $0x8] sm:$0xff] %vm897_vm0, %v882_v8 }
 0x3f3   :  { %v867_v9 = vpop.xlane.xlu0 %866  ;;  %v849_v62 = vpop.xlane.xlu1 %848 }
 0x3f4   :  { %v890_v10 = vsel %vm880_vm15, %v867_v9, %v1910_v18  ;;  %v881_v11 = vsel %vm880_vm15, %v849_v62, %v1915_v22 }
 0x3f5   :  { %907 = vst.msk [vmem:[%s2130_s4 + $0x48] sm:$0xff] %vm897_vm0, %v890_v10  ;;  %898 = vst.msk [vmem:[%s2130_s4] sm:$0xff] %vm897_vm0, %v881_v11 }
 0x3f7   :  { %v855_v12 = vpop.xlane.xlu0 %854  ;;  %v865_v53 = vpop.xlane.xlu1 %864 }
 0x3f8   :  { %v884_v13 = vsel %vm880_vm15, %v855_v12, %v1924_v33  ;;  %v889_v14 = vsel %vm880_vm15, %v865_v53, %v1929_v34 }
 0x3f9   :  { %901 = vst.msk [vmem:[%s2130_s4 + $0x18] sm:$0xff] %vm897_vm0, %v884_v13  ;;  %906 = vst.msk [vmem:[%s2130_s4 + $0x40] sm:$0xff] %vm897_vm0, %v889_v14 }
 0x3fb   :  { %v871_v16 = vpop.xlane.xlu0 %870 }
 0x3fc   :  { %v892_v17 = vsel %vm880_vm15, %v871_v16, %v1938_v38  ;;  %v653_v38 = vsel %vm637_vm3, %v1717_v25, %v572_v30  ;;  %v571_v25 = vsel %vm556_vm2, %v1538_v29, inf }
 0x3fd   :  { %909 = vst.msk [vmem:[%s2130_s4 + $0x58] sm:$0xff] %vm897_vm0, %v892_v17  ;;  %v734_v0 = vsel %vm718_vm6, %v1873_v54, %v653_v38  ;;  %v652_v41 = vsel %vm637_vm3, %v1734_v23, %v571_v25 }
 0x3fe   :  { %v815_v32 = vsel %vm799_vm10, %v798_v60, %v734_v0  ;;  %v733_v29 = vsel %vm718_vm6, %v1891_v15, %v652_v41 }
 0x3ff   :  { %v853_v59 = vpop.xlane.xlu1 %852  ;;  %v814_v54 = vsel %vm799_vm10, %v796_v5, %v733_v29 }
 0x400   :  { %v883_v19 = vsel %vm880_vm15, %v853_v59, %v1945_v35 }
 0x401   :  { %900 = vst.msk [vmem:[%s2130_s4 + $0x10] sm:$0xff] %vm897_vm0, %v883_v19 }
 0x403   :  { %v859_v20 = vpop.xlane.xlu0 %858  ;;  %v869_v21 = vpop.xlane.xlu1 %868 }
 0x404   :  { %v886_v18 = vsel %vm880_vm15, %v859_v20, %v1952_v45  ;;  %v891_v22 = vsel %vm880_vm15, %v869_v21, %v1957_v46 }
 0x405   :  { %903 = vst.msk [vmem:[%s2130_s4 + $0x28] sm:$0xff] %vm897_vm0, %v886_v18  ;;  %908 = vst.msk [vmem:[%s2130_s4 + $0x50] sm:$0xff] %vm897_vm0, %v891_v22 }
 0x407   :  { %v875_v24 = vpop.xlane.xlu0 %874  ;;  %v857_v27 = vpop.xlane.xlu1 %856 }
 0x408   :  { %v894_v28 = vsel %vm880_vm15, %v875_v24, %v1966_v48  ;;  %v885_v63 = vsel %vm880_vm15, %v857_v27, %v1971_v49 }
 0x409   :  { %911 = vst.msk [vmem:[%s2130_s4 + $0x68] sm:$0xff] %vm897_vm0, %v894_v28  ;;  %902 = vst.msk [vmem:[%s2130_s4 + $0x20] sm:$0xff] %vm897_vm0, %v885_v63 }
 0x40b   :  { %v863_v33 = vpop.xlane.xlu0 %862  ;;  %v873_v34 = vpop.xlane.xlu1 %872 }
 0x40c   :  { %v888_v31 = vsel %vm880_vm15, %v863_v33, %v807_v55  ;;  %v893_v37 = vsel %vm880_vm15, %v873_v34, %v812_v56 }
 0x40d   :  { %905 = vst.msk [vmem:[%s2130_s4 + $0x38] sm:$0xff] %vm897_vm0, %v888_v31  ;;  %910 = vst.msk [vmem:[%s2130_s4 + $0x60] sm:$0xff] %vm897_vm0, %v893_v37 }
 0x40f   :  { %v879_v39 = vpop.xlane.xlu0 %878  ;;  %v861_v35 = vpop.xlane.xlu1 %860 }
 0x410   :  { %v896_v36 = vsel %vm880_vm15, %v879_v39, %v815_v32  ;;  %v887_v40 = vsel %vm880_vm15, %v861_v35, %v806_v3 }
 0x411   :  { %913 = vst.msk [vmem:[%s2130_s4 + $0x78] sm:$0xff] %vm897_vm0, %v896_v36  ;;  %904 = vst.msk [vmem:[%s2130_s4 + $0x30] sm:$0xff] %vm897_vm0, %v887_v40 }
 0x413   :  { %v877_v45 = vpop.xlane.xlu1 %876 }
 0x414   :  { %v895_v23 = vsel %vm880_vm15, %v877_v45, %v814_v54 }
 0x415   :  { %912 = vst.msk [vmem:[%s2130_s4 + $0x70] sm:$0xff] %vm897_vm0, %v895_v23 }

</bundles_post_ra>
